<compile_context>
chip_gen: v7x
topology: tpu7x:2x2x1
jax: 0.10.0
libtpu: 0.0.40
codegen_flags: <defaults>
</compile_context>

<pallas_src>
import functools
import math

import jax
import jax.numpy as jnp
from jax.experimental import pallas as pl
from jax.experimental.pallas import tpu as pltpu


# ---------------------------------------------------------------------------
# Fused linear:  out = x @ w_t + bias      (w_t already transposed: (in, out))
# ---------------------------------------------------------------------------
def _linear_kernel(x_ref, wt_ref, b_ref, o_ref):
    acc = jnp.dot(x_ref[...], wt_ref[...], preferred_element_type=jnp.float32)
    acc = acc + b_ref[...]                       # (1, out) broadcast over rows
    o_ref[...] = acc.astype(o_ref.dtype)


def linear_pallas(x2d, w_t, bias=None):
    m, k = x2d.shape
    k2, n = w_t.shape
    assert k == k2
    if bias is None:
        bias = jnp.zeros((n,), x2d.dtype)
    bias2d = bias.reshape(1, n).astype(x2d.dtype)

    # Largest blocks that still leave a 2-wide "parallel" grid axis (v7x: 2 TCs).
    half = m // 2
    block_rows = half if (m % 2 == 0 and half % 8 == 0) else m
    grid = (m // block_rows,)

    return pl.pallas_call(
        _linear_kernel,
        out_shape=jax.ShapeDtypeStruct((m, n), x2d.dtype),
        grid=grid,
        in_specs=[
            pl.BlockSpec((block_rows, k), lambda i: (i, 0)),
            pl.BlockSpec((k, n), lambda i: (0, 0)),
            pl.BlockSpec((1, n), lambda i: (0, 0)),
        ],
        out_specs=pl.BlockSpec((block_rows, n), lambda i: (i, 0)),
        compiler_params=pltpu.CompilerParams(dimension_semantics=("parallel",)),
        cost_estimate=pl.CostEstimate(
            flops=2 * m * k * n,
            transcendentals=0,
            bytes_accessed=4 * (m * k + k * n + n + m * n)),
    )(x2d, w_t, bias2d)


# ---------------------------------------------------------------------------
# Cross-attention core: per batch, attnx = softmax(qy @ kx^T * scale),
# outputs attnx @ vx and attnx @ vy with heads merged (lane-dense stores).
# ---------------------------------------------------------------------------
def _cross_attn_kernel(qkv_x_ref, qkv_y_ref, xo_ref, yo_ref, *, num_heads, scale):
    n = qkv_x_ref.shape[1]
    c3 = qkv_x_ref.shape[2]
    c = c3 // 3
    d = c // num_heads

    qkv_x = qkv_x_ref[0].astype(jnp.float32)     # (N, 3C) lane-dense load
    qkv_y = qkv_y_ref[0].astype(jnp.float32)

    ox_heads = []
    oy_heads = []
    for h in range(num_heads):                   # static unroll over heads
        qy = qkv_y[:, 0 * c + h * d: 0 * c + (h + 1) * d]      # (N, D)
        kx = qkv_x[:, 1 * c + h * d: 1 * c + (h + 1) * d]
        vx = qkv_x[:, 2 * c + h * d: 2 * c + (h + 1) * d]
        vy = qkv_y[:, 2 * c + h * d: 2 * c + (h + 1) * d]

        # attnx = softmax(qy @ kx^T * scale); contraction over D, no transpose.
        s = jax.lax.dot_general(
            qy, kx, (((1,), (1,)), ((), ())),
            preferred_element_type=jnp.float32) * scale         # (N, N)
        s = s - jnp.max(s, axis=-1, keepdims=True)
        e = jnp.exp(s)
        p = e / jnp.sum(e, axis=-1, keepdims=True)

        ox_heads.append(jnp.dot(p, vx, preferred_element_type=jnp.float32))
        oy_heads.append(jnp.dot(p, vy, preferred_element_type=jnp.float32))

    # TODO(synk): the module also computes attny = softmax(qx @ ky^T * scale)
    # (through attn_drop) and never uses it afterwards; that dead branch is omitted.

    xo_ref[0] = jnp.concatenate(ox_heads, axis=-1).astype(xo_ref.dtype)  # (N, C)
    yo_ref[0] = jnp.concatenate(oy_heads, axis=-1).astype(yo_ref.dtype)


def cross_attention_attn(qkv_x, qkv_y, num_heads, scale):
    b, n, c3 = qkv_x.shape
    c = c3 // 3
    d = c // num_heads
    kern = functools.partial(_cross_attn_kernel, num_heads=num_heads, scale=scale)
    return pl.pallas_call(
        kern,
        out_shape=(jax.ShapeDtypeStruct((b, n, c), qkv_x.dtype),
                   jax.ShapeDtypeStruct((b, n, c), qkv_x.dtype)),
        grid=(b,),
        in_specs=[pl.BlockSpec((1, n, c3), lambda i: (i, 0, 0)),
                  pl.BlockSpec((1, n, c3), lambda i: (i, 0, 0))],
        out_specs=(pl.BlockSpec((1, n, c), lambda i: (i, 0, 0)),
                   pl.BlockSpec((1, n, c), lambda i: (i, 0, 0))),
        compiler_params=pltpu.CompilerParams(dimension_semantics=("parallel",)),
        cost_estimate=pl.CostEstimate(
            flops=6 * b * num_heads * n * n * d,
            transcendentals=b * num_heads * n * n,
            bytes_accessed=4 * (2 * b * n * c3 + 2 * b * n * c)),
    )(qkv_x, qkv_y)


# ---------------------------------------------------------------------------
# Full forward, mirroring cross_attention.forward (eval mode).
# ---------------------------------------------------------------------------
@functools.partial(jax.jit, static_argnames=("num_heads",))
def cross_attention_forward(x, y, w_qkv, w_proj, b_proj, num_heads):
    """Returns ((xo, yo), (xo_attn, yo_attn)).

    The PyTorch module returns only (xo, yo) == (proj(x), proj(y)); the
    attention results it computes and then discards are returned as an aux
    pair so the attention kernel can be checked.
    """
    B, N, C = x.shape
    D = C // num_heads
    scale = 1.0 / math.sqrt(D)

    # Fuse x and y into one lane-dense (2*B*N, C) slab for both projections.
    xy = jnp.concatenate([x, y], axis=0).reshape(2 * B * N, C)

    # qkv = Linear(dim, 3*dim, bias=False); weight stored torch-style (3C, C).
    qkv_xy = linear_pallas(xy, jnp.transpose(w_qkv))             # (2BN, 3C)
    qkv_x = qkv_xy[:B * N].reshape(B, N, 3 * C)
    qkv_y = qkv_xy[B * N:].reshape(B, N, 3 * C)
    xo_attn, yo_attn = cross_attention_attn(qkv_x, qkv_y, num_heads, scale)

    # TODO(synk): the original forward overwrites the attention results with
    # xo = self.proj(x), yo = self.proj(y); reproduced literally below
    # (Dropout layers are identity at inference).
    proj_xy = linear_pallas(xy, jnp.transpose(w_proj), b_proj)   # (2BN, C)
    xo = proj_xy[:B * N].reshape(B, N, C)
    yo = proj_xy[B * N:].reshape(B, N, C)
    return (xo, yo), (xo_attn, yo_attn)


# ---------------------------------------------------------------------------
# Pure-JAX reference mirroring the PyTorch forward line by line (eval mode).
# ---------------------------------------------------------------------------
def cross_attention_ref(x, y, w_qkv, w_proj, b_proj, num_heads):
    B, N, C = x.shape
    H = num_heads
    D = C // H
    scale = D ** (-0.5)

    def qkv_split(t):
        q = (t @ w_qkv.T).reshape(B, N, 3, H, D)
        q = jnp.transpose(q, (2, 0, 3, 1, 4))        # (3, B, H, N, D)
        return q[0], q[1], q[2]

    qx, kx, vx = qkv_split(x)
    qy, ky, vy = qkv_split(y)
    attnx = jax.nn.softmax(jnp.einsum("bhqd,bhkd->bhqk", qy, kx) * scale, axis=-1)
    _attny = jax.nn.softmax(jnp.einsum("bhqd,bhkd->bhqk", qx, ky) * scale, axis=-1)  # dead, as in the module
    xo_attn = jnp.einsum("bhqk,bhkd->bhqd", attnx, vx)
    yo_attn = jnp.einsum("bhqk,bhkd->bhqd", attnx, vy)
    xo_attn = jnp.transpose(xo_attn, (0, 2, 1, 3)).reshape(B, N, C)
    yo_attn = jnp.transpose(yo_attn, (0, 2, 1, 3)).reshape(B, N, C)
    xo = x @ w_proj.T + b_proj          # module overwrites with proj(x)/proj(y)
    yo = y @ w_proj.T + b_proj
    return (xo, yo), (xo_attn, yo_attn)


if __name__ == "__main__":
    B, N, DIM, HEADS = 2, 16, 64, 4            # head_dim = 16
    key = jax.random.PRNGKey(0)
    k_x, k_y, k_w1, k_w2, k_b = jax.random.split(key, 5)

    x = jax.random.normal(k_x, (B, N, DIM), jnp.float32)
    y = jax.random.normal(k_y, (B, N, DIM), jnp.float32)
    bound = 1.0 / math.sqrt(DIM)               # torch Linear default init range
    w_qkv = jax.random.uniform(k_w1, (3 * DIM, DIM), jnp.float32, -bound, bound)
    w_proj = jax.random.uniform(k_w2, (DIM, DIM), jnp.float32, -bound, bound)
    b_proj = jax.random.uniform(k_b, (DIM,), jnp.float32, -bound, bound)

    (xo, yo), (xo_attn, yo_attn) = jax.block_until_ready(
        cross_attention_forward(x, y, w_qkv, w_proj, b_proj, num_heads=HEADS))
    (xo_r, yo_r), (xo_attn_r, yo_attn_r) = cross_attention_ref(
        x, y, w_qkv, w_proj, b_proj, HEADS)

    assert xo.shape == (B, N, DIM) and yo.shape == (B, N, DIM)
    tol = dict(atol=1e-2, rtol=1e-2)
    assert jnp.allclose(xo, xo_r, **tol), float(jnp.abs(xo - xo_r).max())
    assert jnp.allclose(yo, yo_r, **tol), float(jnp.abs(yo - yo_r).max())
    assert jnp.allclose(xo_attn, xo_attn_r, **tol), float(jnp.abs(xo_attn - xo_attn_r).max())
    assert jnp.allclose(yo_attn, yo_attn_r, **tol), float(jnp.abs(yo_attn - yo_attn_r).max())
    print("KERNEL_OK")
</pallas_src>

<mosaic_0001>
module attributes {stable_mosaic.version = 11 : i64} {
  func.func @_linear_kernel(%arg0: i32, %arg1: memref<32x64xf32, #tpu.memory_space<vmem>>, %arg2: memref<64x64xf32, #tpu.memory_space<vmem>>, %arg3: memref<1x64xf32, #tpu.memory_space<vmem>>, %arg4: memref<32x64xf32, #tpu.memory_space<vmem>>) attributes {dimension_semantics = [#tpu.dimension_semantics<parallel>], iteration_bounds = array<i64: 2>, scalar_prefetch = 0 : i64, scratch_operands = 0 : i64, tpu.core_type = #tpu.core_type<tc>, window_params = [{transform_indices = @transform_0, window_bounds = array<i64: 32, 64>}, {pipeline_mode = #tpu.pipeline_mode<synchronous>, transform_indices = @transform_1, window_bounds = array<i64: 64, 64>}, {pipeline_mode = #tpu.pipeline_mode<synchronous>, transform_indices = @transform_2, window_bounds = array<i64: 1, 64>}, {transform_indices = @transform_3, window_bounds = array<i64: 32, 64>}]} {
    %c0 = arith.constant 0 : index
    %c0_0 = arith.constant 0 : index
    %0 = vector.load %arg1[%c0, %c0_0] : memref<32x64xf32, #tpu.memory_space<vmem>>, vector<32x64xf32>
    %c0_1 = arith.constant 0 : index
    %c0_2 = arith.constant 0 : index
    %1 = vector.load %arg2[%c0_1, %c0_2] : memref<64x64xf32, #tpu.memory_space<vmem>>, vector<64x64xf32>
    %cst = arith.constant dense<0.000000e+00> : vector<32x64xf32>
    %2 = tpu.matmul %0, %1, %cst {dimension_numbers = #tpu.dot_dimension_numbers<[1], [0], [0], [1], [0, 0, 1, 1], [], []>} : vector<32x64xf32>, vector<64x64xf32>, vector<32x64xf32> -> vector<32x64xf32>
    %c0_3 = arith.constant 0 : index
    %c0_4 = arith.constant 0 : index
    %3 = vector.load %arg3[%c0_3, %c0_4] : memref<1x64xf32, #tpu.memory_space<vmem>>, vector<1x64xf32>
    %4 = vector.broadcast %3 : vector<1x64xf32> to vector<32x64xf32>
    %5 = arith.addf %2, %4 : vector<32x64xf32>
    %c0_5 = arith.constant 0 : index
    %c0_6 = arith.constant 0 : index
    %6 = vector.load %arg4[%c0_5, %c0_6] : memref<32x64xf32, #tpu.memory_space<vmem>>, vector<32x64xf32>
    tpu.vector_store %arg4[%c0_5, %c0_6], %5 {strides = array<i32>} : memref<32x64xf32, #tpu.memory_space<vmem>>, vector<32x64xf32>,
    return
  }
  func.func @transform_0(%arg0: i32) -> (i32, i32) {
    %c0_i32 = arith.constant 0 : i32
    %c0_i32_0 = arith.constant 0 : i32
    return %arg0, %c0_i32 : i32, i32
  }
  func.func @transform_1(%arg0: i32) -> (i32, i32) {
    %c0_i32 = arith.constant 0 : i32
    %c0_i32_0 = arith.constant 0 : i32
    %c0_i32_1 = arith.constant 0 : i32
    return %c0_i32, %c0_i32_0 : i32, i32
  }
  func.func @transform_2(%arg0: i32) -> (i32, i32) {
    %c0_i32 = arith.constant 0 : i32
    %c0_i32_0 = arith.constant 0 : i32
    %c0_i32_1 = arith.constant 0 : i32
    return %c0_i32, %c0_i32_0 : i32, i32
  }
  func.func @transform_3(%arg0: i32) -> (i32, i32) {
    %c0_i32 = arith.constant 0 : i32
    %c0_i32_0 = arith.constant 0 : i32
    return %arg0, %c0_i32 : i32, i32
  }
}

module attributes {stable_mosaic.version = 11 : i64} {
  func.func @_linear_kernel(%arg0: i32, %arg1: memref<32x64xf32, #tpu.memory_space<vmem>>, %arg2: memref<64x192xf32, #tpu.memory_space<vmem>>, %arg3: memref<1x192xf32, #tpu.memory_space<vmem>>, %arg4: memref<32x192xf32, #tpu.memory_space<vmem>>) attributes {dimension_semantics = [#tpu.dimension_semantics<parallel>], iteration_bounds = array<i64: 2>, scalar_prefetch = 0 : i64, scratch_operands = 0 : i64, tpu.core_type = #tpu.core_type<tc>, window_params = [{transform_indices = @transform_0, window_bounds = array<i64: 32, 64>}, {pipeline_mode = #tpu.pipeline_mode<synchronous>, transform_indices = @transform_1, window_bounds = array<i64: 64, 192>}, {pipeline_mode = #tpu.pipeline_mode<synchronous>, transform_indices = @transform_2, window_bounds = array<i64: 1, 192>}, {transform_indices = @transform_3, window_bounds = array<i64: 32, 192>}]} {
    %c0 = arith.constant 0 : index
    %c0_0 = arith.constant 0 : index
    %0 = vector.load %arg1[%c0, %c0_0] : memref<32x64xf32, #tpu.memory_space<vmem>>, vector<32x64xf32>
    %c0_1 = arith.constant 0 : index
    %c0_2 = arith.constant 0 : index
    %1 = vector.load %arg2[%c0_1, %c0_2] : memref<64x192xf32, #tpu.memory_space<vmem>>, vector<64x192xf32>
    %cst = arith.constant dense<0.000000e+00> : vector<32x192xf32>
    %2 = tpu.matmul %0, %1, %cst {dimension_numbers = #tpu.dot_dimension_numbers<[1], [0], [0], [1], [0, 0, 1, 1], [], []>} : vector<32x64xf32>, vector<64x192xf32>, vector<32x192xf32> -> vector<32x192xf32>
    %c0_3 = arith.constant 0 : index
    %c0_4 = arith.constant 0 : index
    %3 = vector.load %arg3[%c0_3, %c0_4] : memref<1x192xf32, #tpu.memory_space<vmem>>, vector<1x192xf32>
    %4 = vector.broadcast %3 : vector<1x192xf32> to vector<32x192xf32>
    %5 = arith.addf %2, %4 : vector<32x192xf32>
    %c0_5 = arith.constant 0 : index
    %c0_6 = arith.constant 0 : index
    %6 = vector.load %arg4[%c0_5, %c0_6] : memref<32x192xf32, #tpu.memory_space<vmem>>, vector<32x192xf32>
    tpu.vector_store %arg4[%c0_5, %c0_6], %5 {strides = array<i32>} : memref<32x192xf32, #tpu.memory_space<vmem>>, vector<32x192xf32>,
    return
  }
  func.func @transform_0(%arg0: i32) -> (i32, i32) {
    %c0_i32 = arith.constant 0 : i32
    %c0_i32_0 = arith.constant 0 : i32
    return %arg0, %c0_i32 : i32, i32
  }
  func.func @transform_1(%arg0: i32) -> (i32, i32) {
    %c0_i32 = arith.constant 0 : i32
    %c0_i32_0 = arith.constant 0 : i32
    %c0_i32_1 = arith.constant 0 : i32
    return %c0_i32, %c0_i32_0 : i32, i32
  }
  func.func @transform_2(%arg0: i32) -> (i32, i32) {
    %c0_i32 = arith.constant 0 : i32
    %c0_i32_0 = arith.constant 0 : i32
    %c0_i32_1 = arith.constant 0 : i32
    return %c0_i32, %c0_i32_0 : i32, i32
  }
  func.func @transform_3(%arg0: i32) -> (i32, i32) {
    %c0_i32 = arith.constant 0 : i32
    %c0_i32_0 = arith.constant 0 : i32
    return %arg0, %c0_i32 : i32, i32
  }
}

module attributes {stable_mosaic.version = 11 : i64} {
  func.func @_cross_attn_kernel(%arg0: i32, %arg1: memref<1x16x192xf32, #tpu.memory_space<vmem>>, %arg2: memref<1x16x192xf32, #tpu.memory_space<vmem>>, %arg3: memref<1x16x64xf32, #tpu.memory_space<vmem>>, %arg4: memref<1x16x64xf32, #tpu.memory_space<vmem>>) attributes {dimension_semantics = [#tpu.dimension_semantics<parallel>], iteration_bounds = array<i64: 2>, scalar_prefetch = 0 : i64, scratch_operands = 0 : i64, tpu.core_type = #tpu.core_type<tc>, window_params = [{transform_indices = @transform_0, window_bounds = array<i64: 1, 16, 192>}, {transform_indices = @transform_1, window_bounds = array<i64: 1, 16, 192>}, {transform_indices = @transform_2, window_bounds = array<i64: 1, 16, 64>}, {transform_indices = @transform_3, window_bounds = array<i64: 1, 16, 64>}]} {
    %c0 = arith.constant 0 : index
    %c0_0 = arith.constant 0 : index
    %c0_1 = arith.constant 0 : index
    %0 = vector.load %arg1[%c0, %c0_0, %c0_1] : memref<1x16x192xf32, #tpu.memory_space<vmem>>, vector<1x16x192xf32>
    %1 = vector.shape_cast %0 : vector<1x16x192xf32> to vector<16x192xf32>
    %c0_2 = arith.constant 0 : index
    %c0_3 = arith.constant 0 : index
    %c0_4 = arith.constant 0 : index
    %2 = vector.load %arg2[%c0_2, %c0_3, %c0_4] : memref<1x16x192xf32, #tpu.memory_space<vmem>>, vector<1x16x192xf32>
    %3 = vector.shape_cast %2 : vector<1x16x192xf32> to vector<16x192xf32>
    %4 = vector.extract_strided_slice %3 {offsets = [0, 0], sizes = [16, 16], strides = [1, 1]} : vector<16x192xf32> to vector<16x16xf32>
    %5 = vector.extract_strided_slice %1 {offsets = [0, 64], sizes = [16, 16], strides = [1, 1]} : vector<16x192xf32> to vector<16x16xf32>
    %6 = vector.extract_strided_slice %1 {offsets = [0, 128], sizes = [16, 16], strides = [1, 1]} : vector<16x192xf32> to vector<16x16xf32>
    %7 = vector.extract_strided_slice %3 {offsets = [0, 128], sizes = [16, 16], strides = [1, 1]} : vector<16x192xf32> to vector<16x16xf32>
    %cst = arith.constant dense<0.000000e+00> : vector<16x16xf32>
    %8 = tpu.matmul %4, %5, %cst {dimension_numbers = #tpu.dot_dimension_numbers<[1], [1], [0], [0], [0, 0, 1, 0], [], []>} : vector<16x16xf32>, vector<16x16xf32>, vector<16x16xf32> -> vector<16x16xf32>
    %cst_5 = arith.constant 2.500000e-01 : f32
    %9 = vector.broadcast %cst_5 : f32 to vector<16x16xf32>
    %10 = arith.mulf %8, %9 : vector<16x16xf32>
    %cst_6 = arith.constant dense<0xFF800000> : vector<16xf32>
    %11 = vector.multi_reduction <maximumf>, %10, %cst_6 [1] : vector<16x16xf32> to vector<16xf32>
    %12 = vector.shape_cast %11 : vector<16xf32> to vector<16x1xf32>
    %13 = vector.broadcast %12 : vector<16x1xf32> to vector<16x16xf32>
    %14 = arith.subf %10, %13 : vector<16x16xf32>
    %15 = math.exp %14 : vector<16x16xf32>
    %cst_7 = arith.constant dense<0.000000e+00> : vector<16xf32>
    %16 = vector.multi_reduction <add>, %15, %cst_7 [1] : vector<16x16xf32> to vector<16xf32>
    %17 = vector.shape_cast %16 : vector<16xf32> to vector<16x1xf32>
    %18 = vector.broadcast %17 : vector<16x1xf32> to vector<16x16xf32>
    %19 = arith.divf %15, %18 : vector<16x16xf32>
    %cst_8 = arith.constant dense<0.000000e+00> : vector<16x16xf32>
    %20 = tpu.matmul %19, %6, %cst_8 {dimension_numbers = #tpu.dot_dimension_numbers<[1], [0], [0], [1], [0, 0, 1, 1], [], []>} : vector<16x16xf32>, vector<16x16xf32>, vector<16x16xf32> -> vector<16x16xf32>
    %cst_9 = arith.constant dense<0.000000e+00> : vector<16x16xf32>
    %21 = tpu.matmul %19, %7, %cst_9 {dimension_numbers = #tpu.dot_dimension_numbers<[1], [0], [0], [1], [0, 0, 1, 1], [], []>} : vector<16x16xf32>, vector<16x16xf32>, vector<16x16xf32> -> vector<16x16xf32>
    %22 = vector.extract_strided_slice %3 {offsets = [0, 16], sizes = [16, 16], strides = [1, 1]} : vector<16x192xf32> to vector<16x16xf32>
    %23 = vector.extract_strided_slice %1 {offsets = [0, 80], sizes = [16, 16], strides = [1, 1]} : vector<16x192xf32> to vector<16x16xf32>
    %24 = vector.extract_strided_slice %1 {offsets = [0, 144], sizes = [16, 16], strides = [1, 1]} : vector<16x192xf32> to vector<16x16xf32>
    %25 = vector.extract_strided_slice %3 {offsets = [0, 144], sizes = [16, 16], strides = [1, 1]} : vector<16x192xf32> to vector<16x16xf32>
    %cst_10 = arith.constant dense<0.000000e+00> : vector<16x16xf32>
    %26 = tpu.matmul %22, %23, %cst_10 {dimension_numbers = #tpu.dot_dimension_numbers<[1], [1], [0], [0], [0, 0, 1, 0], [], []>} : vector<16x16xf32>, vector<16x16xf32>, vector<16x16xf32> -> vector<16x16xf32>
    %cst_11 = arith.constant 2.500000e-01 : f32
    %27 = vector.broadcast %cst_11 : f32 to vector<16x16xf32>
    %28 = arith.mulf %26, %27 : vector<16x16xf32>
    %cst_12 = arith.constant dense<0xFF800000> : vector<16xf32>
    %29 = vector.multi_reduction <maximumf>, %28, %cst_12 [1] : vector<16x16xf32> to vector<16xf32>
    %30 = vector.shape_cast %29 : vector<16xf32> to vector<16x1xf32>
    %31 = vector.broadcast %30 : vector<16x1xf32> to vector<16x16xf32>
    %32 = arith.subf %28, %31 : vector<16x16xf32>
    %33 = math.exp %32 : vector<16x16xf32>
    %cst_13 = arith.constant dense<0.000000e+00> : vector<16xf32>
    %34 = vector.multi_reduction <add>, %33, %cst_13 [1] : vector<16x16xf32> to vector<16xf32>
    %35 = vector.shape_cast %34 : vector<16xf32> to vector<16x1xf32>
    %36 = vector.broadcast %35 : vector<16x1xf32> to vector<16x16xf32>
    %37 = arith.divf %33, %36 : vector<16x16xf32>
    %cst_14 = arith.constant dense<0.000000e+00> : vector<16x16xf32>
    %38 = tpu.matmul %37, %24, %cst_14 {dimension_numbers = #tpu.dot_dimension_numbers<[1], [0], [0], [1], [0, 0, 1, 1], [], []>} : vector<16x16xf32>, vector<16x16xf32>, vector<16x16xf32> -> vector<16x16xf32>
    %cst_15 = arith.constant dense<0.000000e+00> : vector<16x16xf32>
    %39 = tpu.matmul %37, %25, %cst_15 {dimension_numbers = #tpu.dot_dimension_numbers<[1], [0], [0], [1], [0, 0, 1, 1], [], []>} : vector<16x16xf32>, vector<16x16xf32>, vector<16x16xf32> -> vector<16x16xf32>
    %40 = vector.extract_strided_slice %3 {offsets = [0, 32], sizes = [16, 16], strides = [1, 1]} : vector<16x192xf32> to vector<16x16xf32>
    %41 = vector.extract_strided_slice %1 {offsets = [0, 96], sizes = [16, 16], strides = [1, 1]} : vector<16x192xf32> to vector<16x16xf32>
    %42 = vector.extract_strided_slice %1 {offsets = [0, 160], sizes = [16, 16], strides = [1, 1]} : vector<16x192xf32> to vector<16x16xf32>
    %43 = vector.extract_strided_slice %3 {offsets = [0, 160], sizes = [16, 16], strides = [1, 1]} : vector<16x192xf32> to vector<16x16xf32>
    %cst_16 = arith.constant dense<0.000000e+00> : vector<16x16xf32>
    %44 = tpu.matmul %40, %41, %cst_16 {dimension_numbers = #tpu.dot_dimension_numbers<[1], [1], [0], [0], [0, 0, 1, 0], [], []>} : vector<16x16xf32>, vector<16x16xf32>, vector<16x16xf32> -> vector<16x16xf32>
    %cst_17 = arith.constant 2.500000e-01 : f32
    %45 = vector.broadcast %cst_17 : f32 to vector<16x16xf32>
    %46 = arith.mulf %44, %45 : vector<16x16xf32>
    %cst_18 = arith.constant dense<0xFF800000> : vector<16xf32>
    %47 = vector.multi_reduction <maximumf>, %46, %cst_18 [1] : vector<16x16xf32> to vector<16xf32>
    %48 = vector.shape_cast %47 : vector<16xf32> to vector<16x1xf32>
    %49 = vector.broadcast %48 : vector<16x1xf32> to vector<16x16xf32>
    %50 = arith.subf %46, %49 : vector<16x16xf32>
    %51 = math.exp %50 : vector<16x16xf32>
    %cst_19 = arith.constant dense<0.000000e+00> : vector<16xf32>
    %52 = vector.multi_reduction <add>, %51, %cst_19 [1] : vector<16x16xf32> to vector<16xf32>
    %53 = vector.shape_cast %52 : vector<16xf32> to vector<16x1xf32>
    %54 = vector.broadcast %53 : vector<16x1xf32> to vector<16x16xf32>
    %55 = arith.divf %51, %54 : vector<16x16xf32>
    %cst_20 = arith.constant dense<0.000000e+00> : vector<16x16xf32>
    %56 = tpu.matmul %55, %42, %cst_20 {dimension_numbers = #tpu.dot_dimension_numbers<[1], [0], [0], [1], [0, 0, 1, 1], [], []>} : vector<16x16xf32>, vector<16x16xf32>, vector<16x16xf32> -> vector<16x16xf32>
    %cst_21 = arith.constant dense<0.000000e+00> : vector<16x16xf32>
    %57 = tpu.matmul %55, %43, %cst_21 {dimension_numbers = #tpu.dot_dimension_numbers<[1], [0], [0], [1], [0, 0, 1, 1], [], []>} : vector<16x16xf32>, vector<16x16xf32>, vector<16x16xf32> -> vector<16x16xf32>
    %58 = vector.extract_strided_slice %3 {offsets = [0, 48], sizes = [16, 16], strides = [1, 1]} : vector<16x192xf32> to vector<16x16xf32>
    %59 = vector.extract_strided_slice %1 {offsets = [0, 112], sizes = [16, 16], strides = [1, 1]} : vector<16x192xf32> to vector<16x16xf32>
    %60 = vector.extract_strided_slice %1 {offsets = [0, 176], sizes = [16, 16], strides = [1, 1]} : vector<16x192xf32> to vector<16x16xf32>
    %61 = vector.extract_strided_slice %3 {offsets = [0, 176], sizes = [16, 16], strides = [1, 1]} : vector<16x192xf32> to vector<16x16xf32>
    %cst_22 = arith.constant dense<0.000000e+00> : vector<16x16xf32>
    %62 = tpu.matmul %58, %59, %cst_22 {dimension_numbers = #tpu.dot_dimension_numbers<[1], [1], [0], [0], [0, 0, 1, 0], [], []>} : vector<16x16xf32>, vector<16x16xf32>, vector<16x16xf32> -> vector<16x16xf32>
    %cst_23 = arith.constant 2.500000e-01 : f32
    %63 = vector.broadcast %cst_23 : f32 to vector<16x16xf32>
    %64 = arith.mulf %62, %63 : vector<16x16xf32>
    %cst_24 = arith.constant dense<0xFF800000> : vector<16xf32>
    %65 = vector.multi_reduction <maximumf>, %64, %cst_24 [1] : vector<16x16xf32> to vector<16xf32>
    %66 = vector.shape_cast %65 : vector<16xf32> to vector<16x1xf32>
    %67 = vector.broadcast %66 : vector<16x1xf32> to vector<16x16xf32>
    %68 = arith.subf %64, %67 : vector<16x16xf32>
    %69 = math.exp %68 : vector<16x16xf32>
    %cst_25 = arith.constant dense<0.000000e+00> : vector<16xf32>
    %70 = vector.multi_reduction <add>, %69, %cst_25 [1] : vector<16x16xf32> to vector<16xf32>
    %71 = vector.shape_cast %70 : vector<16xf32> to vector<16x1xf32>
    %72 = vector.broadcast %71 : vector<16x1xf32> to vector<16x16xf32>
    %73 = arith.divf %69, %72 : vector<16x16xf32>
    %cst_26 = arith.constant dense<0.000000e+00> : vector<16x16xf32>
    %74 = tpu.matmul %73, %60, %cst_26 {dimension_numbers = #tpu.dot_dimension_numbers<[1], [0], [0], [1], [0, 0, 1, 1], [], []>} : vector<16x16xf32>, vector<16x16xf32>, vector<16x16xf32> -> vector<16x16xf32>
    %cst_27 = arith.constant dense<0.000000e+00> : vector<16x16xf32>
    %75 = tpu.matmul %73, %61, %cst_27 {dimension_numbers = #tpu.dot_dimension_numbers<[1], [0], [0], [1], [0, 0, 1, 1], [], []>} : vector<16x16xf32>, vector<16x16xf32>, vector<16x16xf32> -> vector<16x16xf32>
    %76 = tpu.concatenate %20, %38, %56, %74 in 1 : vector<16x16xf32>, vector<16x16xf32>, vector<16x16xf32>, vector<16x16xf32> -> vector<16x64xf32>
    %c0_28 = arith.constant 0 : index
    %c0_29 = arith.constant 0 : index
    %c0_30 = arith.constant 0 : index
    %77 = vector.load %arg3[%c0_28, %c0_29, %c0_30] : memref<1x16x64xf32, #tpu.memory_space<vmem>>, vector<1x16x64xf32>
    %78 = vector.shape_cast %77 : vector<1x16x64xf32> to vector<16x64xf32>
    %79 = vector.shape_cast %76 : vector<16x64xf32> to vector<1x16x64xf32>
    tpu.vector_store %arg3[%c0_28, %c0_29, %c0_30], %79 {strides = array<i32>} : memref<1x16x64xf32, #tpu.memory_space<vmem>>, vector<1x16x64xf32>,
    %80 = tpu.concatenate %21, %39, %57, %75 in 1 : vector<16x16xf32>, vector<16x16xf32>, vector<16x16xf32>, vector<16x16xf32> -> vector<16x64xf32>
    %c0_31 = arith.constant 0 : index
    %c0_32 = arith.constant 0 : index
    %c0_33 = arith.constant 0 : index
    %81 = vector.load %arg4[%c0_31, %c0_32, %c0_33] : memref<1x16x64xf32, #tpu.memory_space<vmem>>, vector<1x16x64xf32>
    %82 = vector.shape_cast %81 : vector<1x16x64xf32> to vector<16x64xf32>
    %83 = vector.shape_cast %80 : vector<16x64xf32> to vector<1x16x64xf32>
    tpu.vector_store %arg4[%c0_31, %c0_32, %c0_33], %83 {strides = array<i32>} : memref<1x16x64xf32, #tpu.memory_space<vmem>>, vector<1x16x64xf32>,
    return
  }
  func.func @transform_0(%arg0: i32) -> (i32, i32, i32) {
    %c0_i32 = arith.constant 0 : i32
    %c0_i32_0 = arith.constant 0 : i32
    %c0_i32_1 = arith.constant 0 : i32
    return %arg0, %c0_i32, %c0_i32_0 : i32, i32, i32
  }
  func.func @transform_1(%arg0: i32) -> (i32, i32, i32) {
    %c0_i32 = arith.constant 0 : i32
    %c0_i32_0 = arith.constant 0 : i32
    %c0_i32_1 = arith.constant 0 : i32
    return %arg0, %c0_i32, %c0_i32_0 : i32, i32, i32
  }
  func.func @transform_2(%arg0: i32) -> (i32, i32, i32) {
    %c0_i32 = arith.constant 0 : i32
    %c0_i32_0 = arith.constant 0 : i32
    %c0_i32_1 = arith.constant 0 : i32
    return %arg0, %c0_i32, %c0_i32_0 : i32, i32, i32
  }
  func.func @transform_3(%arg0: i32) -> (i32, i32, i32) {
    %c0_i32 = arith.constant 0 : i32
    %c0_i32_0 = arith.constant 0 : i32
    %c0_i32_1 = arith.constant 0 : i32
    return %arg0, %c0_i32, %c0_i32_0 : i32, i32, i32
  }
}

</mosaic_0001>

<bundles_post_ra>
// kernel: cross_attention_forward.5
= control target key start
LH: loop header
LB: loop body
LE: loop exit
PB: predicated region body
PF: predicated region fallthrough
CT: control target
= control target key end

     0   :  { %s461_s12 = smov 0   ;;  %s516_s0 = inlined_call_operand.vmem [shape: f32[64,64], index: 0, kind: input, shape index: {}]   ;;  %s517_s1 = inlined_call_operand.vmem [shape: f32[64,64], index: 1, kind: input, shape index: {}]   ;;  %s518_s2 = inlined_call_operand.vmem [shape: f32[1,64], index: 2, kind: input, shape index: {}]   ;;  %s519_s3 = inlined_call_operand.vmem [shape: f32[64,64], index: 3, kind: output, shape index: {}]  }
   0x1 LB: > { %s351_s13 = sadd.s32 4294967295, %s439_s12   ;;  %p355_p0 = scmp.ge.s32.totalorder %s439_s12, 1  ;;  %s439_s12 = sphi %s461_s12, %s13_s12  }
   0x2   : > { %p138_p1 = scmp.lt.s32.totalorder %s439_s12, 3 }
   0x4   : > { %p139_p2 = pnand %p355_p0, %p138_p1 }
   0x5   : > { %v178_v0 = vld [vmem:[%s517_s1] sm:$0xff] (!%p139_p2)  ;;  %v179_v1 = vld [vmem:[%s517_s1 + $0x8] sm:$0xff] (!%p139_p2)  ;;  %v180_v2 = vld [vmem:[%s517_s1 + $0x10] sm:$0xff] (!%p139_p2)  ;;  %s356_s20 = sshll.u32 (!%p139_p2), %s351_s13, 2  ;;  %vm193_vm0 = vcmask (!%p139_p2), 523264  }
   0x6   : > { %142 = sbr.rel (%p139_p2) target bundleno = 241 (0xf1), region = 32  ;;  %v401_v3 = vpack.c.bf16 (!%p139_p2), %v179_v1, %v178_v0  ;;  %v181_v4 = vld [vmem:[%s517_s1 + $0x18] sm:$0xff] (!%p139_p2)  ;;  %p163_p3 = scmp.lt.s32.totalorder (!%p139_p2), %s356_s20, 7  ;;  %v182_v6 = vld [vmem:[%s517_s1 + $0x20] sm:$0xff] (!%p139_p2)  ;;  %v183_v7 = vld [vmem:[%s517_s1 + $0x28] sm:$0xff] (!%p139_p2) }
   0x7   : > { %v405_v5 = vpack.c.bf16 (!%p139_p2), %v181_v4, %v180_v2  ;;  %v409_v8 = vpack.c.bf16 (!%p139_p2), %v183_v7, %v182_v6  ;;  %v184_v9 = vld [vmem:[%s517_s1 + $0x30] sm:$0xff] (!%p139_p2)  ;;  %v185_v10 = vld [vmem:[%s517_s1 + $0x38] sm:$0xff] (!%p139_p2)  ;;  %v360_v16 = vld [vmem:[%s518_s2] ss:$0 sm:$0xff] (!%p139_p2) }
   0x8   : > { %402 = vmatprep.subr.bf16.mxu0 (!%p139_p2), %v401_v3  ;;  %417 = vmatprep.subr.bf16.mxu1 (!%p139_p2), %v401_v3  ;;  %v413_v13 = vpack.c.bf16 (!%p139_p2), %v185_v10, %v184_v9 }
   0x9   : > { %404 = vmatpush3.bf16.msra.mxu0 (!%p139_p2), %v401_v3  ;;  %421 = vmatpush3.bf16.msra.mxu1 (!%p139_p2), %v401_v3 }
   0xa   : > { %406 = vmatprep.subr.bf16.mxu0 (!%p139_p2), %v405_v5  ;;  %418 = vmatprep.subr.bf16.mxu1 (!%p139_p2), %v405_v5 }
   0xd   : > { %s521_s20 = smov (!%p163_p3, %s356_s20), 7  ;;  %408 = vmatpush3.bf16.msra.mxu0 %v405_v5  ;;  %422 = vmatpush3.bf16.msra.mxu1 %v405_v5 }
   0xe   : > { %s357_s27 = sshll.u32 %s521_s20, 3  ;;  %410 = vmatprep.subr.bf16.mxu0 %v409_v8  ;;  %419 = vmatprep.subr.bf16.mxu1 %v409_v8 }
   0xf   : > { %s166_s7 = scalar_lea.vmem %s516_s0, %s357_s27  ;;  %s172_s13 = scalar_lea.vmem %s519_s3, %s357_s27 }
  0x10   : > { %v174_v11 = vld [vmem:[%s166_s7] sm:$0xff]  ;;  %v176_v12 = vld [vmem:[%s166_s7 + $0x10] sm:$0xff]  ;;  %v175_v14 = vld [vmem:[%s166_s7 + $0x8] sm:$0xff] }
  0x11   : > { %395 = vmatprep.mubr.msk.f32.mxu0 %vm193_vm0, %v174_v11  ;;  %398 = vmatprep.mubr.msk.f32.mxu1 %vm193_vm0, %v176_v12  ;;  %v177_v15 = vld [vmem:[%s166_s7 + $0x18] sm:$0xff] }
  0x12   : > { %412 = vmatpush3.bf16.msra.mxu0 %v409_v8  ;;  %423 = vmatpush3.bf16.msra.mxu1 %v409_v8 }
  0x13   : > { %414 = vmatprep.subr.bf16.mxu0 %v413_v13  ;;  %420 = vmatprep.subr.bf16.mxu1 %v413_v13 }
  0x16   : > { %416 = vmatpush3.bf16.msra.mxu0 %v413_v13  ;;  %424 = vmatpush3.bf16.msra.mxu1 %v413_v13 }
  0x19   : > { %396 = vmatmul.mubr.msk.f32.vlgmr.msra.gmra.mrb[0].mxu0 %vm193_vm0, %v175_v14  ;;  %399 = vmatmul.mubr.msk.f32.vlgmr.msra.gmra.mrb[0].mxu1 %vm193_vm0, %v177_v15 }
  0xec   : > { %v397_v17 = vpop.f32.mrb[0].mxu0  ;;  %v400_v18 = vpop.f32.mrb[0].mxu1 }
  0xed   : > { %v272_v19 = vpop.f32.mrb[1].mxu0  ;;  %v282_v20 = vpop.f32.mrb[1].mxu1  ;;  %v278_v23 = vadd.f32 %v397_v17, %v360_v16  ;;  %v288_v24 = vadd.f32 %v400_v18, %v360_v16 }
  0xee   : > { %v273_v21 = vadd.f32 %v360_v16, %v272_v19  ;;  %v283_v22 = vadd.f32 %v360_v16, %v282_v20 }
  0xef   : > { %292 = vst.msk [vmem:[%s172_s13 + $0x8] sm:$0xff] %vm193_vm0, %v278_v23  ;;  %294 = vst.msk [vmem:[%s172_s13 + $0x18] sm:$0xff] %vm193_vm0, %v288_v24 }
  0xf0   : > { %291 = vst.msk [vmem:[%s172_s13] sm:$0xff] %vm193_vm0, %v273_v21  ;;  %293 = vst.msk [vmem:[%s172_s13 + $0x10] sm:$0xff] %vm193_vm0, %v283_v22 }
  0xf1 PF: > { %s13_s12 = sadd.s32 1, %s439_s12  }
  0xf2   : > { %p10_p4 = scmp.ge.s32.totalorder %s13_s12, 4  }
  0xf4   :  { %12 = sbr.rel (!%p10_p4) target bundleno = 1 (0x1), region = 62 }

// kernel: cross_attention_forward.3
= control target key start
LH: loop header
LB: loop body
LE: loop exit
PB: predicated region body
PF: predicated region fallthrough
CT: control target
= control target key end

     0   :  { %s455_s12 = smov 0   ;;  %s536_s0 = inlined_call_operand.vmem [shape: f32[64,64], index: 0, kind: input, shape index: {}]   ;;  %s537_s1 = inlined_call_operand.vmem [shape: f32[64,192], index: 1, kind: input, shape index: {}]   ;;  %s538_s2 = inlined_call_operand.vmem [shape: f32[1,192], index: 2, kind: input, shape index: {}]   ;;  %s539_s3 = inlined_call_operand.vmem [shape: f32[64,192], index: 3, kind: output, shape index: {}]  }
   0x1 LB: > { %s376_s13 = sadd.s32 4294967295, %s432_s12   ;;  %p380_p0 = scmp.ge.s32.totalorder %s432_s12, 1  ;;  %s432_s12 = sphi %s455_s12, %s13_s12  }
   0x2   : > { %p138_p1 = scmp.lt.s32.totalorder %s432_s12, 3 }
   0x4   : > { %p139_p2 = pnand %p380_p0, %p138_p1 }
   0x5   : > { %v181_v0 = vld [vmem:[%s537_s1 + $0x8] sm:$0xff] (!%p139_p2)  ;;  %v183_v1 = vld [vmem:[%s537_s1 + $0x18] sm:$0xff] (!%p139_p2)  ;;  %v180_v2 = vld [vmem:[%s537_s1] sm:$0xff] (!%p139_p2)  ;;  %s381_s20 = sshll.u32 (!%p139_p2), %s376_s13, 2  ;;  %v434_v7 = vmov (!%p139_p2), 0.0   ;;  %vm208_vm0 = vcmask (!%p139_p2), 523264   ;;  %v198_v29 = vlaneseq (!%p139_p2) }
   0x6   : > { %142 = sbr.rel (%p139_p2) target bundleno = 244 (0xf4), region = 32  ;;  %v393_v3 = vpack.c.bf16 (!%p139_p2), %v183_v1, %v181_v0  ;;  %v182_v4 = vld [vmem:[%s537_s1 + $0x10] sm:$0xff] (!%p139_p2)  ;;  %v185_v5 = vld [vmem:[%s537_s1 + $0x28] sm:$0xff] (!%p139_p2)  ;;  %v187_v6 = vld [vmem:[%s537_s1 + $0x38] sm:$0xff] (!%p139_p2)  ;;  %285 = vmatprep.mubr.f32.mxu0 (!%p139_p2), %v434_v7  ;;  %297 = vmatprep.mubr.f32.mxu1 (!%p139_p2), %v434_v7  ;;  %p164_p3 = scmp.lt.s32.totalorder (!%p139_p2), %s381_s20, 7 }
   0x7   : > { %v395_v8 = vpack.c.bf16 (!%p139_p2), %v182_v4, %v180_v2  ;;  %v397_v9 = vpack.c.bf16 (!%p139_p2), %v187_v6, %v185_v5  ;;  %v184_v10 = vld [vmem:[%s537_s1 + $0x20] sm:$0xff] (!%p139_p2)  ;;  %v186_v11 = vld [vmem:[%s537_s1 + $0x30] sm:$0xff] (!%p139_p2)  ;;  %v189_v12 = vld [vmem:[%s537_s1 + $0x48] sm:$0xff] (!%p139_p2)  ;;  %v199_v30 = vshrl.u32 (!%p139_p2), %v198_v29, 7 }
   0x8   : > { %394 = vmatprep.subr.bf16.mxu0 (!%p139_p2), %v393_v3  ;;  %409 = vmatprep.subr.bf16.mxu1 (!%p139_p2), %v393_v3  ;;  %v191_v13 = vld [vmem:[%s537_s1 + $0x58] sm:$0xff] (!%p139_p2)  ;;  %v399_v14 = vpack.c.bf16 (!%p139_p2), %v186_v11, %v184_v10  ;;  %v188_v16 = vld [vmem:[%s537_s1 + $0x40] sm:$0xff] (!%p139_p2)  ;;  %v190_v17 = vld [vmem:[%s537_s1 + $0x50] sm:$0xff] (!%p139_p2) }
   0x9   : > { %396 = vmatpush1.bf16.msra.mxu0 (!%p139_p2), %v395_v8  ;;  %413 = vmatpush1.bf16.msra.mxu1 (!%p139_p2), %v395_v8  ;;  %v401_v15 = vpack.c.bf16 (!%p139_p2), %v191_v13, %v189_v12  ;;  %v193_v18 = vld [vmem:[%s537_s1 + $0x68] sm:$0xff] (!%p139_p2)  ;;  %v195_v19 = vld [vmem:[%s537_s1 + $0x78] sm:$0xff] (!%p139_p2)  ;;  %v403_v20 = vpack.c.bf16 (!%p139_p2), %v190_v17, %v188_v16  ;;  %v192_v22 = vld [vmem:[%s537_s1 + $0x60] sm:$0xff] (!%p139_p2)  ;;  %v200_v31 = vsub.s32 (!%p139_p2), 0, %v199_v30  ;;  %v204_v33 = vsub.s32 (!%p139_p2), 1, %v199_v30 }
   0xa   : > { %398 = vmatprep.subr.bf16.mxu0 (!%p139_p2), %v397_v9  ;;  %410 = vmatprep.subr.bf16.mxu1 (!%p139_p2), %v397_v9  ;;  %v405_v21 = vpack.c.bf16 (!%p139_p2), %v195_v19, %v193_v18  ;;  %v194_v23 = vld [vmem:[%s537_s1 + $0x70] sm:$0xff] (!%p139_p2)  ;;  %v196_v32 = vld [vmem:[%s538_s2] sm:$0x3] (!%p139_p2) }
   0xb   : > { %v407_v24 = vpack.c.bf16 (!%p139_p2), %v194_v23, %v192_v22  ;;  %v201_v34 = vrot.slane (!%p139_p2), %v196_v32, %v200_v31  ;;  %v205_v35 = vrot.slane (!%p139_p2), %v196_v32, %v204_v33 }
   0xd   : > { %s541_s20 = smov (!%p164_p3, %s381_s20), 7  ;;  %400 = vmatpush1.bf16.msra.mxu0 %v399_v14  ;;  %414 = vmatpush1.bf16.msra.mxu1 %v399_v14 }
   0xe   : > { %402 = vmatprep.subr.bf16.mxu0 %v401_v15  ;;  %411 = vmatprep.subr.bf16.mxu1 %v401_v15  ;;  %s382_s22 = sshll.u32 %s541_s20, 3  ;;  %s392_s28 = sshll.u32 %s541_s20, 4 }
   0xf   : > { %s167_s25 = scalar_lea.vmem %s536_s0, %s382_s22  ;;  %s174_s4 = scalar_lea.vmem %s539_s3, %s392_s28 }
  0x10   : > { %v176_v25 = vld [vmem:[%s167_s25] sm:$0xff]  ;;  %v178_v26 = vld [vmem:[%s167_s25 + $0x10] sm:$0xff]  ;;  %v177_v27 = vld [vmem:[%s167_s25 + $0x8] sm:$0xff] }
  0x11   : > { %404 = vmatpush1.bf16.msra.mxu0 %v403_v20  ;;  %415 = vmatpush1.bf16.msra.mxu1 %v403_v20  ;;  %v179_v28 = vld [vmem:[%s167_s25 + $0x18] sm:$0xff] }
  0x12   : > { %406 = vmatprep.subr.bf16.mxu0 %v405_v21  ;;  %412 = vmatprep.subr.bf16.mxu1 %v405_v21 }
  0x15   : > { %408 = vmatpush1.bf16.msra.mxu0 %v407_v24  ;;  %416 = vmatpush1.bf16.msra.mxu1 %v407_v24 }
  0x18   : > { %386 = vmatmul.mubr.msk.f32.vlgmr.msra.gmra.mrb[0].mxu0 %vm208_vm0, %v176_v25  ;;  %388 = vmatmul.mubr.msk.f32.vlgmr.msra.gmra.mrb[0].mxu1 %vm208_vm0, %v178_v26 }
  0x19   : > { %291 = vmatprep.mubr.f32.mxu0 %v434_v7  ;;  %303 = vmatprep.mubr.f32.mxu1 %v434_v7 }
  0x1c   : > { %387 = vmatmul.mubr.msk.f32.gmra.mrb[2].mxu0 %vm208_vm0, %v177_v27  ;;  %389 = vmatmul.mubr.msk.f32.gmra.mrb[2].mxu1 %vm208_vm0, %v179_v28 }
  0xeb   : > { %v287_v36 = vpop.f32.mrb[0].mxu0  ;;  %v299_v37 = vpop.f32.mrb[0].mxu1 }
  0xec   : > { %v288_v38 = vadd.f32 %v287_v36, %v201_v34  ;;  %v289_v39 = vpop.f32.mrb[1].mxu0  ;;  %v301_v40 = vpop.f32.mrb[1].mxu1  ;;  %v300_v48 = vadd.f32 %v299_v37, %v201_v34 }
  0xed   : > { %v290_v41 = vadd.f32 %v289_v39, %v205_v35  ;;  %v302_v51 = vadd.f32 %v301_v40, %v205_v35 }
  0xee   : > { %310 = vst [vmem:[%s174_s4] sm:$0xff] %v288_v38  ;;  %314 = vst [vmem:[%s174_s4 + $0x20] sm:$0xff] %v300_v48 }
  0xef   : > { %311 = vst.msk [vmem:[%s174_s4 + $0x8] sm:$0xff] %vm208_vm0, %v290_v41  ;;  %v293_v42 = vpop.f32.mrb[2].mxu0  ;;  %v305_v43 = vpop.f32.mrb[2].mxu1  ;;  %315 = vst.msk [vmem:[%s174_s4 + $0x28] sm:$0xff] %vm208_vm0, %v302_v51 }
  0xf0   : > { %v294_v44 = vadd.f32 %v293_v42, %v201_v34  ;;  %v295_v45 = vpop.f32.mrb[3].mxu0  ;;  %v306_v46 = vadd.f32 %v305_v43, %v201_v34  ;;  %v307_v47 = vpop.f32.mrb[3].mxu1 }
  0xf1   : > { %v296_v49 = vadd.f32 %v295_v45, %v205_v35  ;;  %v308_v50 = vadd.f32 %v307_v47, %v205_v35 }
  0xf2   : > { %312 = vst [vmem:[%s174_s4 + $0x10] sm:$0xff] %v294_v44  ;;  %316 = vst [vmem:[%s174_s4 + $0x30] sm:$0xff] %v306_v46 }
  0xf3   : > { %313 = vst.msk [vmem:[%s174_s4 + $0x18] sm:$0xff] %vm208_vm0, %v296_v49  ;;  %317 = vst.msk [vmem:[%s174_s4 + $0x38] sm:$0xff] %vm208_vm0, %v308_v50 }
  0xf4 PF: > { %s13_s12 = sadd.s32 1, %s432_s12  }
  0xf5   : > { %p10_p4 = scmp.ge.s32.totalorder %s13_s12, 4  }
  0xf7   :  { %12 = sbr.rel (!%p10_p4) target bundleno = 1 (0x1), region = 62 }

// kernel: cross_attention_forward.4
= control target key start
LH: loop header
LB: loop body
LE: loop exit
PB: predicated region body
PF: predicated region fallthrough
CT: control target
= control target key end

     0   :  { %9 = vsyncpa [#allocation3], 0  ;;  %s2350_s0 = inlined_call_operand.vmem [shape: f32[2,16,192], index: 0, kind: input, shape index: {}]   ;;  %s2351_s1 = inlined_call_operand.vmem [shape: f32[2,16,192], index: 1, kind: input, shape index: {}]   ;;  %s2352_s2 = inlined_call_operand.hbm [shape: f32[2,16,64], index: 2, kind: output, shape index: {0}]   ;;  %s2353_s3 = inlined_call_operand.hbm [shape: f32[2,16,64], index: 3, kind: output, shape index: {1}]  }
   0x1   :  { %11 = vsyncpa [#allocation3 + $0x1], 0 }
   0x2   :  { %12 = vsyncpa [#allocation5], 0 }
   0x3   :  { %14 = vsyncpa [#allocation5 + $0x1], 0  ;;  %s2045_s12 = smov 0   ;;  %s2047_s13 = smov 0  }
   0x4   :  { %s2049_s14 = smov 0   ;;  %s2051_s15 = smov 0  }
   0x5 LB: > { %s2066_s16 = sadd.s32 4294967295, %s2012_s15   ;;  %s1541_s17 = sadd.s32 4294967294, %s2012_s15   ;;  %s2012_s15 = sphi %s2051_s15, %s2361_s15   ;;  %s2008_s14 = sphi %s2049_s14, %s2360_s14   ;;  %s2004_s13 = sphi %s2047_s13, %s2359_s13   ;;  %s2000_s12 = sphi %s2045_s12, %s2358_s12  }
   0x6   : > { %s2070_s18 = sadd.s32 1, %s2012_s15   ;;  %s79_s19 = sadd.s32 1, %s2008_s14 }
   0x7   : > { %s76_s20 = ssub.s32 %s2012_s15, %s2070_s18  ;;  %p89_p0 = scmp.ne.s32.totalorder %s2008_s14, %s2004_s13 }
   0x8   : > { %p77_p1 = scmp.eq.s32.totalorder %s76_s20, 0  ;;  %p90_p2 = scmp.eq.s32.totalorder %s2066_s16, 1 }
   0x9   : > { %p95_p3 = scmp.ne.s32.totalorder %s2004_s13, %s2000_s12  ;;  %p96_p4 = scmp.eq.s32.totalorder %s1541_s17, 1 }
   0xa   : > { %s2081_s21 = scalar_select %p77_p1, %s2008_s14, %s79_s19  }
   0xb   : > { %p2083_p5 = por %p90_p2, %p89_p0  ;;  %p2087_p6 = por %p96_p4, %p95_p3 }
   0xc   : > { %p1544_p7 = scmp.ge.s32.totalorder %s2012_s15, 1  ;;  %p156_p8 = scmp.lt.s32.totalorder %s2012_s15, 3 }
   0xe   : > { %p157_p9 = pnand %p1544_p7, %p156_p8 }
   0xf   : > { %p190_p10 = scmp.lt.s32.totalorder (!%p157_p9), %s2066_s16, 1  ;;  %vm214_vm0 = vcmask (!%p157_p9), 130048   ;;  %s2014_s5 = smov (!%p157_p9), 64   ;;  %vm1359_vm2 = vcmask (!%p157_p9), 261120   ;;  %vm1362_vm3 = vcmask (!%p157_p9), 392192   ;;  %vm1365_vm4 = vcmask (!%p157_p9), 523264  }
  0x10   : > { %160 = sbr.rel (%p157_p9) target bundleno = 1124 (0x464), region = 28  ;;  %s2015_s6 = smov (!%p157_p9), 32   ;;  %vm2121_vm1 = vmpackc.low (!%p157_p9), %vm214_vm0, %vm214_vm0 }
  0x11   : > { %s2016_s7 = smov (!%p157_p9), 48   ;;  %s2017_s8 = smov (!%p157_p9), 112  }
  0x12   : > { %s2018_s9 = smov (!%p157_p9), 16   ;;  %s2019_s10 = smov (!%p157_p9), 96  }
  0x13   : > { %s2020_s11 = smov (!%p157_p9), 80   ;;  %s2236_s17 = sand.u32 (!%p157_p9), 1, %s2004_s13  }
  0x14   : > { %s1545_s19 = sshll.u32 (!%p157_p9), %s2236_s17, 4 }
  0x15   : > { %s182_s20 = scalar_lea.vmem (!%p157_p9), [#allocation2], %s1545_s19  ;;  %s2243_s26 = scalar_lea.vmem (!%p157_p9), [#allocation4], %s1545_s19 }
  0x16   : > { %s1435_s27 = sshll.u32 (!%p157_p9), %s2243_s26, 4  ;;  %s2261_s27 = int_to_ptr.vmem [resolvable:$true] %s1435_s27 }
  0x17   : > { %s191_s24 = scalar_select %p190_p10, %s2066_s16, 1 }
  0x19   : > { %s1591_s25 = sshll.u32 %s191_s24, 5  ;;  %s1419_s24 = sshll.u32 %s182_s20, 4  ;;  %s2241_s24 = int_to_ptr.vmem [resolvable:$true] %s1419_s24 }
  0x1a   : > { %s2098_s28 = scalar_lea.vmem %s2350_s0, %s1591_s25  ;;  %s2103_s4 = scalar_lea.vmem %s2351_s1, %s1591_s25 }
  0x1b   : > { %v200_v0 = vld [vmem:[%s2098_s28] sm:$0xff]  ;;  %v202_v1 = vld [vmem:[%s2098_s28 + $0x10] sm:$0xff]  ;;  %v201_v50 = vld [vmem:[%s2098_s28 + $0x8] sm:$0xff]  ;;  %s1593_s25 = sshll.u32 %s2066_s16, 8 }
  0x1c   : > { %v204_v2 = vld [vmem:[%s2103_s4] sm:$0xff]  ;;  %v1836_v3 = vpack.i.bf16 %v202_v1, %v200_v0  ;;  %v206_v4 = vld [vmem:[%s2103_s4 + $0x10] sm:$0xff]  ;;  %v203_v51 = vld [vmem:[%s2098_s28 + $0x18] sm:$0xff]  ;;  %s2255_s30 = scalar_lea.hbm %s2352_s2, %s1593_s25 }
  0x1d   : > { %1647 = vmatprep.mubr.msk.f32.mxu0 %vm214_vm0, %v204_v2  ;;  %v2157_v52 = vpack.i.bf16 %v203_v51, %v201_v50  ;;  %v205_v1 = vld [vmem:[%s2103_s4 + $0x8] sm:$0xff] }
  0x1e   : > { %1837 = vrot.lane.b32.xlu0 %v1836_v3, %s2014_s5  ;;  %1847 = vrot.lane.b32.xlu1 %v1836_v3, %s2015_s6  ;;  %s1918_s5 = scalar_lea.vmem %s2241_s24, 256 }
  0x1f   : > { %p1919_p11 = scmp.ne.s32.totalorder %s2241_s24, %s1918_s5 }
  0x21   : > { %p1920_p12 = pnand %p1919_p11, %p2083_p5 }
  0x22   : > { %1842 = vrot.lane.b32.xlu0 %v1836_v3, %s2016_s7  ;;  %480 = vrot.lane.b32.xlu1 %v204_v2, %s2017_s8 }
  0x23   : > { %p1921_p13 = pneg %p1920_p12 }
  0x26   : > { %482 = vrot.lane.b32.xlu0 %v206_v4, %s2017_s8  ;;  %1852 = vrot.lane.b32.xlu1 %v1836_v3, %s2018_s9 }
  0x2a   : > { %767 = vrot.lane.b32.xlu0 %v204_v2, %s2019_s10  ;;  %769 = vrot.lane.b32.xlu1 %v206_v4, %s2019_s10 }
  0x2e   : > { %1050 = vrot.lane.b32.xlu0 %v204_v2, %s2020_s11  ;;  %1052 = vrot.lane.b32.xlu1 %v206_v4, %s2020_s11  ;;  %v207_v2 = vld [vmem:[%s2103_s4 + $0x18] sm:$0xff]  ;;  %s1401_s4 = scalar_lea.sflag [#allocation3], %s2236_s17 }
  0x2f   : > { %v1871_v3 = vpack.i.bf16 %v207_v2, %v205_v1 }
  0x90   : > { %v1838_v5 = vpop.permute.xlu0 %1837  ;;  %v1848_v6 = vpop.permute.xlu1 %1847 }
  0x91   : > { %v1840_v7 = vunpack.i.h.bf16 %v1838_v5  ;;  %v1839_v8 = vunpack.i.l.bf16 %v1838_v5  ;;  %v1850_v16 = vunpack.i.h.bf16 %v1848_v6  ;;  %v1849_v17 = vunpack.i.l.bf16 %v1848_v6 }
  0x92   : > { %v1733_v5 = vpack.c.bf16 %v203_v51, %v201_v50 }
  0x93   : > { %v1727_v10 = vpack.c.bf16 %v1840_v7, %v1839_v8  ;;  %v1755_v18 = vpack.c.bf16 %v1850_v16, %v1849_v17  ;;  %v1737_v7 = vpack.c.bf16 %v207_v2, %v205_v1 }
  0x94   : > { %v1843_v11 = vpop.permute.xlu0 %1842  ;;  %v481_v14 = vpop.permute.xlu1 %480  ;;  %1734 = vmatprep.subr.bf16.mxu1 %v1733_v5 }
  0x95   : > { %1729 = vmatprep.subr.msk.bf16.mxu0 %vm2121_vm1, %v1727_v10  ;;  %v1845_v12 = vunpack.i.h.bf16 %v1843_v11  ;;  %v1844_v13 = vunpack.i.l.bf16 %v1843_v11  ;;  %1736 = vmatpush3.bf16.msra.mxu1 %v1733_v5 }
  0x96   : > { %1732 = vmatpush3.bf16.xpose.msk.msra.mxu0 %vm2121_vm1, %v1727_v10  ;;  %1738 = vmatprep.subr.bf16.mxu1 %v1737_v7 }
  0x97   : > { %v1741_v15 = vpack.c.bf16 %v1845_v12, %v1844_v13 }
  0x98   : > { %v1853_v19 = vpop.permute.xlu1 %1852  ;;  %v483_v20 = vpop.permute.xlu0 %482 }
  0x99   : > { %1743 = vmatprep.subr.msk.bf16.mxu0 %vm2121_vm1, %v1741_v15  ;;  %v1855_v21 = vunpack.i.h.bf16 %v1853_v19  ;;  %v1854_v22 = vunpack.i.l.bf16 %v1853_v19 }
  0x9b   : > { %v1769_v23 = vpack.c.bf16 %v1855_v21, %v1854_v22 }
  0x9c   : > { %v768_v24 = vpop.permute.xlu0 %767  ;;  %v770_v25 = vpop.permute.xlu1 %769 }
  0x9d   : > { %1648 = vmatmul.mubr.msk.f32.vlgmr.msra.gmra.mrb[0].mxu0 %vm214_vm0, %v206_v4 }
  0x9e   : > { %1746 = vmatpush3.bf16.xpose.msk.msra.mxu0 %vm2121_vm1, %v1741_v15  ;;  %1668 = vmatprep.mubr.msk.f32.mxu0 %vm214_vm0, %v481_v14 }
  0x9f   : > { %1757 = vmatprep.subr.msk.bf16.mxu0 %vm2121_vm1, %v1755_v18 }
  0xa0   : > { %v1051_v26 = vpop.permute.xlu0 %1050  ;;  %v1053_v27 = vpop.permute.xlu1 %1052 }
  0xa5   : > { %1669 = vmatmul.mubr.msk.f32.vlgmr.msra.gmra.mrb[2].mxu0 %vm214_vm0, %v483_v20 }
  0xa6   : > { %1760 = vmatpush3.bf16.xpose.msk.msra.mxu0 %vm2121_vm1, %v1755_v18  ;;  %1689 = vmatprep.mubr.msk.f32.mxu0 %vm214_vm0, %v768_v24 }
  0xa7   : > { %1771 = vmatprep.subr.msk.bf16.mxu0 %vm2121_vm1, %v1769_v23 }
  0xad   : > { %1690 = vmatmul.mubr.msk.f32.vlgmr.msra.gmra.mrb[4].mxu0 %vm214_vm0, %v770_v25 }
  0xae   : > { %1774 = vmatpush3.bf16.xpose.msk.msra.mxu0 %vm2121_vm1, %v1769_v23  ;;  %1710 = vmatprep.mubr.msk.f32.mxu0 %vm214_vm0, %v1051_v26 }
  0xb5   : > { %1711 = vmatmul.mubr.msk.f32.vlgmr.msra.gmra.mrb[6].mxu0 %vm214_vm0, %v1053_v27 }
 0x170   : > { %v1649_v28 = vpop.f32.mrb[0].mxu0 }
 0x171   : > { %v301_v29 = vmul.f32 0.25, %v1649_v28  ;;  %v291_v30 = vpop.f32.mrb[1].mxu0 }
 0x172   : > { %v300_v31 = vmul.f32 0.25, %v291_v30 }
 0x173   : > { %v305_v32 = vsel %vm214_vm0, %v301_v29, -inf }
 0x174   : > { %306 = vmax.xlane.f32.xlu1 %v305_v32  ;;  %v302_v33 = vsel %vm214_vm0, %v300_v31, -inf }
 0x175   : > { %303 = vmax.xlane.f32.xlu0 %v302_v33 }
 0x178   : > { %v1670_v34 = vpop.f32.mrb[2].mxu0 }
 0x179   : > { %v562_v35 = vpop.f32.mrb[3].mxu0  ;;  %v572_v37 = vmul.f32 0.25, %v1670_v34 }
 0x17a   : > { %v571_v36 = vmul.f32 0.25, %v562_v35 }
 0x17b   : > { %v576_v40 = vsel %vm214_vm0, %v572_v37, -inf }
 0x17c   : > { %v573_v38 = vsel %vm214_vm0, %v571_v36, -inf }
 0x17d   : > { %574 = vmax.xlane.f32.xlu0 %v573_v38 }
 0x180   : > { %v1691_v39 = vpop.f32.mrb[4].mxu0 }
 0x181   : > { %v859_v41 = vmul.f32 0.25, %v1691_v39  ;;  %v849_v42 = vpop.f32.mrb[5].mxu0  ;;  %577 = vmax.xlane.f32.xlu0 %v576_v40 }
 0x182   : > { %v858_v43 = vmul.f32 0.25, %v849_v42 }
 0x183   : > { %v863_v44 = vsel %vm214_vm0, %v859_v41, -inf }
 0x184   : > { %v860_v45 = vsel %vm214_vm0, %v858_v43, -inf }
 0x185   : > { %861 = vmax.xlane.f32.xlu1 %v860_v45  ;;  %864 = vmax.xlane.f32.xlu0 %v863_v44 }
 0x188   : > { %v1712_v46 = vpop.f32.mrb[6].mxu0 }
 0x189   : > { %v1142_v47 = vmul.f32 0.25, %v1712_v46  ;;  %v1132_v48 = vpop.f32.mrb[7].mxu0 }
 0x18a   : > { %v1141_v53 = vmul.f32 0.25, %v1132_v48 }
 0x18b   : > { %v1146_v49 = vsel %vm214_vm0, %v1142_v47, -inf }
 0x18c   : > { %1147 = vmax.xlane.f32.xlu0 %v1146_v49  ;;  %v1143_v54 = vsel %vm214_vm0, %v1141_v53, -inf }
 0x196   : > { %1857 = vrot.lane.b32.xlu1 %v2157_v52, %s2017_s8 }
 0x1ba   : > { %1144 = vmax.xlane.f32.xlu1 %v1143_v54 }
 0x1cb   : > { %1867 = vrot.lane.b32.xlu1 %v2157_v52, %s2019_s10 }
 0x201   : > { %v307_v55 = vpop.xlane.xlu1 %306 }
 0x202   : > { %v309_v56 = vsub.f32 %v301_v29, %v307_v55  ;;  %v304_v57 = vpop.xlane.xlu0 %303 }
 0x203   : > { %v308_v58 = vsub.f32 %v300_v31, %v304_v57 }
 0x204   : > { %v312_v59 = vmul.f32 1.442695, %v309_v56 }
 0x205   : > { %v310_v60 = vmul.f32 1.442695, %v308_v58 }
 0x206   : > { %1886 = vpow2.f32 %v312_v59 }
 0x207   : > { %1888 = vpow2.f32 %v310_v60 }
 0x20a   : > { %v575_v4 = vpop.xlane.xlu0 %574 }
 0x20b   : > { %v579_v9 = vsub.f32 %v571_v36, %v575_v4 }
 0x20d   : > { %v581_v14 = vmul.f32 1.442695, %v579_v9 }
 0x20e   : > { %v578_v6 = vpop.xlane.xlu0 %577 }
 0x20f   : > { %v580_v8 = vsub.f32 %v572_v37, %v578_v6 }
 0x210   : > { %v2164_v61 = vpop.eup %1886 }
 0x211   : > { %v2166_v62 = vpop.eup %1888  ;;  %v317_v63 = vsel %vm214_vm0, %v2164_v61, 0.0  ;;  %v583_v12 = vmul.f32 1.442695, %v580_v8 }
 0x212   : > { %318 = vadd.xlane.f32.xlu0 %v317_v63  ;;  %v314_v0 = vsel %vm214_vm0, %v2166_v62, 0.0  ;;  %v865_v10 = vpop.xlane.xlu0 %864  ;;  %v862_v11 = vpop.xlane.xlu1 %861 }
 0x213   : > { %315 = vadd.xlane.f32.xlu1 %v314_v0  ;;  %v867_v13 = vsub.f32 %v859_v41, %v865_v10  ;;  %v866_v15 = vsub.f32 %v858_v43, %v862_v11  ;;  %1890 = vpow2.f32 %v583_v12 }
 0x214   : > { %1892 = vpow2.f32 %v581_v14 }
 0x215   : > { %v870_v17 = vmul.f32 1.442695, %v867_v13  ;;  %v868_v19 = vmul.f32 1.442695, %v866_v15 }
 0x216   : > { %v1858_v22 = vpop.permute.xlu1 %1857 }
 0x217   : > { %1894 = vpow2.f32 %v870_v17  ;;  %v1860_v42 = vunpack.i.h.bf16 %v1858_v22  ;;  %v1859_v43 = vunpack.i.l.bf16 %v1858_v22 }
 0x218   : > { %1896 = vpow2.f32 %v868_v19 }
 0x219   : > { %v1148_v16 = vpop.xlane.xlu0 %1147 }
 0x21a   : > { %v1150_v18 = vsub.f32 %v1142_v47, %v1148_v16  ;;  %v1747_v47 = vpack.c.bf16 %v1860_v42, %v1859_v43 }
 0x21c   : > { %v1153_v20 = vmul.f32 1.442695, %v1150_v18 }
 0x21d   : > { %v2176_v21 = vpop.eup %1890 }
 0x21e   : > { %1898 = vpow2.f32 %v1153_v20  ;;  %v1893_v23 = vpop.eup %1892  ;;  %v588_v24 = vsel %vm214_vm0, %v2176_v21, 0.0 }
 0x21f   : > { %v585_v27 = vsel %vm214_vm0, %v1893_v23, 0.0 }
 0x221   : > { %v2180_v25 = vpop.eup %1894 }
 0x222   : > { %v2183_v28 = vpop.eup %1896  ;;  %v875_v31 = vsel %vm214_vm0, %v2180_v25, 0.0 }
 0x223   : > { %v872_v33 = vsel %vm214_vm0, %v2183_v28, 0.0 }
 0x224   : > { %1872 = vrot.lane.b32.xlu1 %v1871_v3, %s2019_s10 }
 0x228   : > { %1862 = vrot.lane.b32.xlu0 %v1871_v3, %s2017_s8  ;;  %v2187_v32 = vpop.eup %1898 }
 0x229   : > { %v1158_v34 = vsel %vm214_vm0, %v2187_v32, 0.0 }
 0x247   : > { %v1145_v26 = vpop.xlane.xlu1 %1144  ;;  %589 = vadd.xlane.f32.xlu0 %v588_v24 }
 0x248   : > { %v1149_v29 = vsub.f32 %v1141_v53, %v1145_v26  ;;  %586 = vadd.xlane.f32.xlu1 %v585_v27 }
 0x24a   : > { %v1151_v30 = vmul.f32 1.442695, %v1149_v29 }
 0x24b   : > { %876 = vadd.xlane.f32.xlu0 %v875_v31  ;;  %v1868_v37 = vpop.permute.xlu1 %1867 }
 0x24c   : > { %1900 = vpow2.f32 %v1151_v30  ;;  %873 = vadd.xlane.f32.xlu1 %v872_v33  ;;  %v1870_v59 = vunpack.i.h.bf16 %v1868_v37  ;;  %v1869_v60 = vunpack.i.l.bf16 %v1868_v37 }
 0x24e   : > { %v1761_v1 = vpack.c.bf16 %v1870_v59, %v1869_v60 }
 0x24f   : > { %1159 = vadd.xlane.f32.xlu0 %v1158_v34 }
 0x256   : > { %v2193_v35 = vpop.eup %1900 }
 0x257   : > { %v1155_v36 = vsel %vm214_vm0, %v2193_v35, 0.0 }
 0x258   : > { %1156 = vadd.xlane.f32.xlu1 %v1155_v36 }
 0x265   : > { %1877 = vrot.lane.b32.xlu0 %v2157_v52, %s2020_s11 }
 0x269   : > { %1882 = vrot.lane.b32.xlu1 %v1871_v3, %s2020_s11 }
 0x29f   : > { %v319_v38 = vpop.xlane.xlu0 %318 }
 0x2a0   : > { %1902 = vrcp.f32 %v319_v38  ;;  %v316_v39 = vpop.xlane.xlu1 %315 }
 0x2a1   : > { %1904 = vrcp.f32 %v316_v39 }
 0x2a3   : > { %v1863_v44 = vpop.permute.xlu0 %1862 }
 0x2a4   : > { %v1865_v48 = vunpack.i.h.bf16 %v1863_v44  ;;  %v1864_v49 = vunpack.i.l.bf16 %v1863_v44  ;;  %v1873_v51 = vpop.permute.xlu1 %1872 }
 0x2a5   : > { %v1875_v2 = vunpack.i.h.bf16 %v1873_v51  ;;  %v1874_v3 = vunpack.i.l.bf16 %v1873_v51 }
 0x2a6   : > { %v1751_v50 = vpack.c.bf16 %v1865_v48, %v1864_v49 }
 0x2a7   : > { %v1765_v9 = vpack.c.bf16 %v1875_v2, %v1874_v3 }
 0x2aa   : > { %v1903_v40 = vpop.eup %1902 }
 0x2ab   : > { %v1905_v41 = vpop.eup %1904  ;;  %v323_v46 = vmul.f32 %v1903_v40, %v2164_v61 }
 0x2ac   : > { %v321_v45 = vmul.f32 %v1905_v41, %v2166_v62 }
 0x2ae   : > { %1654 = vmatprep.mubr.msk.f32.mxu1 %vm214_vm0, %v321_v45 }
 0x2af   : > { %1655 = vmatmul.mubr.msk.f32.vlgmr.msra.gmra.mrb[0].mxu1 %vm214_vm0, %v323_v46 }
 0x2b0   : > { %1740 = vmatpush3.bf16.msra.mxu1 %v1737_v7  ;;  %1661 = vmatprep.mubr.msk.f32.mxu1 %vm214_vm0, %v321_v45 }
 0x2b1   : > { %1748 = vmatprep.subr.bf16.mxu1 %v1747_v47 }
 0x2b3   : > { %1662 = vmatmul.mubr.msk.f32.vlgmr.msra.gmra.mrb[2].mxu1 %vm214_vm0, %v323_v46 }
 0x2b4   : > { %1750 = vmatpush3.bf16.msra.mxu1 %v1747_v47 }
 0x2b5   : > { %1752 = vmatprep.subr.bf16.mxu1 %v1751_v50 }
 0x2d4   : > { %v590_v52 = vpop.xlane.xlu0 %589 }
 0x2d5   : > { %1906 = vrcp.f32 %v590_v52  ;;  %v587_v53 = vpop.xlane.xlu1 %586 }
 0x2d6   : > { %1908 = vrcp.f32 %v587_v53 }
 0x2d8   : > { %v877_v54 = vpop.xlane.xlu0 %876 }
 0x2d9   : > { %v874_v55 = vpop.xlane.xlu1 %873 }
 0x2da   : > { %1910 = vrcp.f32 %v874_v55 }
 0x2db   : > { %1912 = vrcp.f32 %v877_v54 }
 0x2dc   : > { %v1160_v57 = vpop.xlane.xlu0 %1159 }
 0x2dd   : > { %1914 = vrcp.f32 %v1160_v57 }
 0x2df   : > { %v1907_v56 = vpop.eup %1906 }
 0x2e0   : > { %v1909_v58 = vpop.eup %1908  ;;  %v594_v62 = vmul.f32 %v1907_v56, %v2176_v21  ;;  %v1878_v63 = vpop.permute.xlu0 %1877 }
 0x2e1   : > { %v592_v61 = vmul.f32 %v1909_v58, %v1893_v23  ;;  %v1880_v5 = vunpack.i.h.bf16 %v1878_v63  ;;  %v1879_v6 = vunpack.i.l.bf16 %v1878_v63 }
 0x2e3   : > { %1675 = vmatprep.mubr.msk.f32.mxu1 %vm214_vm0, %v592_v61  ;;  %v1775_v12 = vpack.c.bf16 %v1880_v5, %v1879_v6 }
 0x2e4   : > { %v1911_v0 = vpop.eup %1910  ;;  %1676 = vmatmul.mubr.msk.f32.vlgmr.msra.gmra.mrb[4].mxu1 %vm214_vm0, %v594_v62 }
 0x2e5   : > { %1754 = vmatpush3.bf16.msra.mxu1 %v1751_v50  ;;  %v1157_v4 = vpop.xlane.xlu1 %1156  ;;  %1682 = vmatprep.mubr.msk.f32.mxu1 %vm214_vm0, %v592_v61  ;;  %v1913_v7 = vpop.eup %1912  ;;  %v879_v8 = vmul.f32 %v1911_v0, %v2183_v28 }
 0x2e6   : > { %1916 = vrcp.f32 %v1157_v4  ;;  %1762 = vmatprep.subr.bf16.mxu1 %v1761_v1  ;;  %v881_v11 = vmul.f32 %v1913_v7, %v2180_v25 }
 0x2e7   : > { %v1915_v16 = vpop.eup %1914 }
 0x2e8   : > { %1683 = vmatmul.mubr.msk.f32.vlgmr.msra.gmra.mrb[6].mxu1 %vm214_vm0, %v594_v62  ;;  %v1164_v19 = vmul.f32 %v1915_v16, %v2187_v32 }
 0x2e9   : > { %1764 = vmatpush3.bf16.msra.mxu1 %v1761_v1  ;;  %1696 = vmatprep.mubr.msk.f32.mxu1 %vm214_vm0, %v879_v8  ;;  %v1883_v10 = vpop.permute.xlu1 %1882 }
 0x2ea   : > { %1766 = vmatprep.subr.bf16.mxu1 %v1765_v9  ;;  %v1885_v13 = vunpack.i.h.bf16 %v1883_v10  ;;  %v1884_v14 = vunpack.i.l.bf16 %v1883_v10 }
 0x2ec   : > { %1697 = vmatmul.mubr.msk.f32.vlgmr.msra.gmra.mrb[8].mxu1 %vm214_vm0, %v881_v11  ;;  %v1779_v15 = vpack.c.bf16 %v1885_v13, %v1884_v14 }
 0x2ed   : > { %1768 = vmatpush3.bf16.msra.mxu1 %v1765_v9  ;;  %1703 = vmatprep.mubr.msk.f32.mxu1 %vm214_vm0, %v879_v8 }
 0x2ee   : > { %1776 = vmatprep.subr.bf16.mxu1 %v1775_v12 }
 0x2f0   : > { %v1917_v17 = vpop.eup %1916  ;;  %1704 = vmatmul.mubr.msk.f32.vlgmr.msra.gmra.mrb[10].mxu1 %vm214_vm0, %v881_v11 }
 0x2f1   : > { %1778 = vmatpush3.bf16.msra.mxu1 %v1775_v12  ;;  %v1162_v18 = vmul.f32 %v1917_v17, %v2193_v35 }
 0x2f2   : > { %1780 = vmatprep.subr.bf16.mxu1 %v1779_v15 }
 0x2f3   : > { %1717 = vmatprep.mubr.msk.f32.mxu1 %vm214_vm0, %v1162_v18 }
 0x2f4   : > { %1718 = vmatmul.mubr.msk.f32.vlgmr.msra.gmra.mrb[12].mxu1 %vm214_vm0, %v1164_v19 }
 0x2f5   : > { %1782 = vmatpush3.bf16.msra.mxu1 %v1779_v15  ;;  %1724 = vmatprep.mubr.msk.f32.mxu1 %vm214_vm0, %v1162_v18 }
 0x2f8   : > { %1725 = vmatmul.mubr.msk.f32.vlgmr.msra.gmra.mrb[14].mxu1 %vm214_vm0, %v1164_v19 }
 0x382   : > { %v1656_v20 = vpop.f32.mrb[0].mxu1 }
 0x383   : > { %v396_v21 = vpop.f32.mrb[1].mxu1 }
 0x386   : > { %v1663_v22 = vpop.f32.mrb[2].mxu1 }
 0x387   : > { %v471_v23 = vpop.f32.mrb[3].mxu1 }
 0x3b7   : > { %v1677_v24 = vpop.f32.mrb[4].mxu1 }
 0x3b8   : > { %1337 = vrot.lane.b32.xlu1 %v1677_v24, %s2018_s9  ;;  %v675_v25 = vpop.f32.mrb[5].mxu1 }
 0x3b9   : > { %1335 = vrot.lane.b32.xlu0 %v675_v25, %s2018_s9 }
 0x3bb   : > { %v1684_v26 = vpop.f32.mrb[6].mxu1 }
 0x3bc   : > { %1372 = vrot.lane.b32.xlu1 %v1684_v26, %s2018_s9  ;;  %v758_v27 = vpop.f32.mrb[7].mxu1 }
 0x3bd   : > { %1370 = vrot.lane.b32.xlu0 %v758_v27, %s2018_s9 }
 0x3bf   : > { %v1698_v28 = vpop.f32.mrb[8].mxu1 }
 0x3c0   : > { %1345 = vrot.lane.b32.xlu1 %v1698_v28, %s2015_s6  ;;  %v960_v29 = vpop.f32.mrb[9].mxu1 }
 0x3c1   : > { %1343 = vrot.lane.b32.xlu0 %v960_v29, %s2015_s6 }
 0x3c3   : > { %v1705_v30 = vpop.f32.mrb[10].mxu1 }
 0x3c4   : > { %1380 = vrot.lane.b32.xlu1 %v1705_v30, %s2015_s6  ;;  %v1041_v31 = vpop.f32.mrb[11].mxu1 }
 0x3c5   : > { %1378 = vrot.lane.b32.xlu0 %v1041_v31, %s2015_s6  ;;  %s2021_s6 = smov [#allocation2]  }
 0x3c7   : > { %v1719_v32 = vpop.f32.mrb[12].mxu1 }
 0x3c8   : > { %1353 = vrot.lane.b32.xlu1 %v1719_v32, %s2016_s7  ;;  %v1243_v33 = vpop.f32.mrb[13].mxu1 }
 0x3c9   : > { %1351 = vrot.lane.b32.xlu0 %v1243_v33, %s2016_s7 }
 0x3cb   : > { %v1726_v34 = vpop.f32.mrb[14].mxu1 }
 0x3cc   : > { %1388 = vrot.lane.b32.xlu1 %v1726_v34, %s2016_s7  ;;  %v1324_v35 = vpop.f32.mrb[15].mxu1 }
 0x3cd   : > { %1386 = vrot.lane.b32.xlu0 %v1324_v35, %s2016_s7  ;;  %s1922_s7 = sshll.u32 %s2021_s6, 4  ;;  %s1923_s7 = int_to_ptr.vmem [resolvable:$false] %s1922_s7 }
 0x3ce   : > { %s1924_s8 = scalar_lea.vmem %s1923_s7, 512  ;;  %p1925_p0 = scmp.lt.s32.totalorder %s2241_s24, %s1923_s7 }
 0x3cf   : > { %p1926_p1 = scmp.lt.s32.totalorder %s1924_s8, %s1918_s5 }
 0x3d1   : > { %p1927_p2 = por %p1926_p1, %p1925_p0 }
 0x3d3   : > { %p1928_p3 = pnand %p1927_p2, %p1921_p13 }
 0x42a   : > { %v1338_v36 = vpop.permute.xlu1 %1337 }
 0x42b   : > { %v1336_v37 = vpop.permute.xlu0 %1335  ;;  %v1358_v44 = vsel %vm214_vm0, %v1656_v20, %v1338_v36 }
 0x42c   : > { %v1357_v45 = vsel %vm214_vm0, %v396_v21, %v1336_v37 }
 0x42e   : > { %v1373_v38 = vpop.permute.xlu1 %1372 }
 0x42f   : > { %v1371_v39 = vpop.permute.xlu0 %1370  ;;  %v1393_v52 = vsel %vm214_vm0, %v1663_v22, %v1373_v38 }
 0x430   : > { %v1392_v53 = vsel %vm214_vm0, %v471_v23, %v1371_v39 }
 0x432   : > { %v1346_v40 = vpop.permute.xlu1 %1345 }
 0x433   : > { %v1344_v41 = vpop.permute.xlu0 %1343  ;;  %v1361_v46 = vsel %vm1359_vm2, %v1358_v44, %v1346_v40 }
 0x434   : > { %v1360_v48 = vsel %vm1359_vm2, %v1357_v45, %v1344_v41 }
 0x436   : > { %v1381_v42 = vpop.permute.xlu1 %1380 }
 0x437   : > { %v1379_v43 = vpop.permute.xlu0 %1378  ;;  %v1395_v54 = vsel %vm1359_vm2, %v1393_v52, %v1381_v42 }
 0x43a   : > { %v1354_v47 = vpop.permute.xlu1 %1353 }
 0x43b   : > { %v1364_v49 = vsel %vm1362_vm3, %v1361_v46, %v1354_v47  ;;  %v1352_v50 = vpop.permute.xlu0 %1351 }
 0x43c   : > { %1367 = vst.msk [vmem:[%s182_s20 + $0x8] sm:$0xff] %vm1365_vm4, %v1364_v49  ;;  %v1363_v51 = vsel %vm1362_vm3, %v1360_v48, %v1352_v50 }
 0x43d   : > { %1366 = vst.msk [vmem:[%s182_s20] sm:$0xff] %vm1365_vm4, %v1363_v51 }
 0x43e   : > { %v1389_v55 = vpop.permute.xlu1 %1388 }
 0x43f   : > { %1931 = shalt.err (!%p1928_p3)
}
 0x440   : > { %s1932_s9 = scalar_lea.hbm %s2255_s30, 256  ;;  %s1936_s19 = scalar_lea.hbm %s2352_s2, 512 }
 0x441   : > { %p1933_p4 = scmp.ne.s32.totalorder %s2255_s30, %s1932_s9  ;;  %p1937_p9 = scmp.lt.u32.totalorder %s2255_s30, %s2352_s2 }
 0x442   : > { %p1938_p10 = scmp.lt.u32.totalorder %s1936_s19, %s1932_s9  ;;  %p1940_p12 = scmp.lt.u32.totalorder %s1932_s9, %s2255_s30 }
 0x443   : > { %p1934_p7 = pnand %p1933_p4, %p2083_p5 }
 0x444   : > { %p1939_p11 = por %p1938_p10, %p1937_p9 }
 0x445   : > { %p1935_p8 = pneg %p1934_p7 }
 0x446   : > { %p1941_p13 = por %p1940_p12, %p1939_p11 }
 0x448   : > { %p1942_p0 = pnand %p1941_p13, %p1935_p8 }
 0x44a   : > { %1945 = shalt.err (!%p1942_p0)
}
 0x44b   : > { %s2022_s29 = smov 128   ;;  %s2023_s5 = smov 8   ;;  %v1394_v56 = vsel %vm1359_vm2, %v1392_v53, %v1379_v43  ;;  %v1397_v57 = vsel %vm1362_vm3, %v1395_v54, %v1389_v55  ;;  %v1387_v58 = vpop.permute.xlu0 %1386 }
 0x44c   : > { %1783 = dma.vmem_to_hbm [thread:$0]  (%p2083_p5), %s2241_s24, 256, %s2255_s30, %s1401_s4, %s2022_s29, %s2022_s29, %s2023_s5   ;;  %v1396_v59 = vsel %vm1362_vm3, %v1394_v56, %v1387_v58 }
 0x44d   : > { %s2299_s8 = scalar_lea.hbm %s2353_s3, %s1593_s25  ;;  %1399 = vst.msk [vmem:[%s2243_s26 + $0x8] sm:$0xff] %vm1365_vm4, %v1397_v57  ;;  %1398 = vst.msk [vmem:[%s2243_s26] sm:$0xff] %vm1365_vm4, %v1396_v59  ;;  %s1406_s9 = scalar_lea.sflag [#allocation5], %s2236_s17 }
 0x44e   : > { %s1946_s24 = scalar_lea.vmem %s2261_s27, 256  ;;  %s2024_s30 = smov [#allocation4]  }
 0x44f   : > { %p1947_p1 = scmp.ne.s32.totalorder %s2261_s27, %s1946_s24  ;;  %s1950_s4 = sshll.u32 %s2024_s30, 4  ;;  %s1951_s4 = int_to_ptr.vmem [resolvable:$false] %s1950_s4 }
 0x450   : > { %s1952_s16 = scalar_lea.vmem %s1951_s4, 512  ;;  %p1953_p4 = scmp.lt.s32.totalorder %s2261_s27, %s1951_s4 }
 0x451   : > { %p1948_p2 = pnand %p1947_p1, %p2083_p5  ;;  %p1954_p7 = scmp.lt.s32.totalorder %s1952_s16, %s1946_s24 }
 0x453   : > { %p1949_p3 = pneg %p1948_p2  ;;  %p1955_p8 = por %p1954_p7, %p1953_p4 }
 0x455   : > { %p1956_p9 = pnand %p1955_p8, %p1949_p3 }
 0x457   : > { %1959 = shalt.err (!%p1956_p9)
}
 0x458   : > { %s1960_s25 = scalar_lea.hbm %s2299_s8, 256  ;;  %s1964_s11 = scalar_lea.hbm %s2353_s3, 512 }
 0x459   : > { %p1961_p10 = scmp.ne.s32.totalorder %s2299_s8, %s1960_s25  ;;  %p1965_p13 = scmp.lt.u32.totalorder %s2299_s8, %s2353_s3 }
 0x45a   : > { %p1966_p0 = scmp.lt.u32.totalorder %s1964_s11, %s1960_s25  ;;  %p1968_p2 = scmp.lt.u32.totalorder %s1960_s25, %s2299_s8 }
 0x45b   : > { %p1962_p11 = pnand %p1961_p10, %p2083_p5 }
 0x45c   : > { %p1967_p1 = por %p1966_p0, %p1965_p13 }
 0x45d   : > { %p1963_p12 = pneg %p1962_p11 }
 0x45e   : > { %p1969_p3 = por %p1968_p2, %p1967_p1 }
 0x460   : > { %p1970_p4 = pnand %p1969_p3, %p1963_p12 }
 0x462   : > { %1973 = shalt.err (!%p1970_p4)
}
 0x463   : > { %1784 = dma.vmem_to_hbm [thread:$0]  (%p2083_p5), %s2261_s27, 256, %s2299_s8, %s1406_s9, %s2022_s29, %s2022_s29, %s2023_s5  }
 0x464 PF: > { %p1794_p7 = scmp.ge.s32.totalorder %s2012_s15, 2  ;;  %s1450_s28 = sand.u32 1, %s2000_s12  }
 0x465   : > { %s1451_s6 = scalar_lea.sflag [#allocation3], %s1450_s28 }
 0x466   : > { %p1788_p8 = pnand %p1794_p7, %p2087_p6 }
 0x468   : > { %1991 = dma.done.wait (!%p1788_p8), %s1451_s6, 256  }
 0x469   : > { %1993 = vsyncadd (!%p1788_p8), %s1451_s6, 4294967040  ;;  %s1460_s22 = scalar_lea.sflag [#allocation5], %s1450_s28 }
 0x46a   : > { %1995 = dma.done.wait (!%p1788_p8), %s1460_s22, 256  }
 0x46b   : > { %1997 = vsyncadd (!%p1788_p8), %s1460_s22, 4294967040  ;;  %p17_p5 = scmp.ge.s32.totalorder %s2070_s18, 4   ;;  %s2358_s12 = smov %s2004_s13 }
 0x46c   : > { %s2359_s13 = smov %s2008_s14  ;;  %s2360_s14 = smov %s2081_s21 }
 0x46d   : > { %s2361_s15 = smov %s2070_s18  ;;  %19 = sbr.rel (!%p17_p5) target bundleno = 5 (0x5), region = 83 }
 0x474   :  { %1465 = vsyncpa [#allocation3], 1 }
 0x475   :  { %1467 = vsyncpa [#allocation3 + $0x1], 1 }
 0x476   :  { %1468 = vsyncpa [#allocation5], 1 }
 0x477   :  { %1470 = vsyncpa [#allocation5 + $0x1], 1 }

</bundles_post_ra>
